<compile_context>
chip_gen: v7x
topology: tpu7x:2x2x1
jax: 0.10.0
libtpu: 0.0.40
codegen_flags: <defaults>
</compile_context>

<pallas_src>
import functools
from math import sqrt

import jax
import jax.numpy as jnp
from jax.experimental import pallas as pl
from jax.experimental.pallas import tpu as pltpu


# ----------------------------------------------------------------------------
# Kernel 1: fused K/V projection.  Weights are pre-transposed to (d_in, d_out)
# so the kernel never transposes a VMEM tile.
# ----------------------------------------------------------------------------
def _kv_proj_kernel(src_ref, val_ref, wk_ref, bk_ref, wv_ref, bv_ref,
                    k_ref, v_ref):
    k = jnp.dot(src_ref[...], wk_ref[...],
                preferred_element_type=jnp.float32) + bk_ref[...]
    v = jnp.dot(val_ref[...], wv_ref[...],
                preferred_element_type=jnp.float32) + bv_ref[...]
    k_ref[...] = k.astype(k_ref.dtype)
    v_ref[...] = v.astype(v_ref.dtype)


def kv_projection(source_embedding, value_embedding, wk_t, bk, wv_t, bv):
    S = source_embedding.shape[0]
    dk = wk_t.shape[1]
    dt = source_embedding.dtype
    return pl.pallas_call(
        _kv_proj_kernel,
        out_shape=(jax.ShapeDtypeStruct((S, dk), dt),
                   jax.ShapeDtypeStruct((S, dk), dt)),
    )(source_embedding, value_embedding, wk_t, bk, wv_t, bv)


# ----------------------------------------------------------------------------
# Kernel 2: fused q-projection + attention + output projection.
# Grid = (B,).  Each program:
#   q   = target[b] @ WqT_scaled + bq_scaled            (scale folded in)
#   for each head h:  s = qh @ kh^T ; p = softmax(s) ; ctx_h = p @ vh
#                     acc += ctx_h @ Wo[h*E:(h+1)*E, :]
#   out[b] = acc + bo                                    (lane-dense (L, d_llm))
# ----------------------------------------------------------------------------
def _fused_attn_kernel(x_ref, k_ref, v_ref, wq_ref, bq_ref, wo_ref, bo_ref,
                       o_ref, *, n_heads, d_keys):
    x = x_ref[0]                                   # (L, d_model)
    q = jnp.dot(x, wq_ref[...],
                preferred_element_type=jnp.float32) + bq_ref[...]   # (L, H*E)
    k = k_ref[...]                                 # (S, H*E)
    v = v_ref[...]                                 # (S, H*E)
    wo = wo_ref[...]                               # (H*E, d_llm)

    L = q.shape[0]
    d_llm = wo.shape[1]
    acc = jnp.zeros((L, d_llm), jnp.float32)

    for h in range(n_heads):                       # static, tiny H
        lo = h * d_keys
        qh = q[:, lo:lo + d_keys]                  # (L, E)
        kh = k[:, lo:lo + d_keys]                  # (S, E)
        vh = v[:, lo:lo + d_keys]                  # (S, E)

        # scores: contract over E without an explicit in-kernel transpose.
        s = jax.lax.dot_general(qh, kh, (((1,), (1,)), ((), ())),
                                preferred_element_type=jnp.float32)  # (L, S)
        s = s - jnp.max(s, axis=-1, keepdims=True)
        p = jnp.exp(s)
        p = p * pl.reciprocal(jnp.sum(p, axis=-1, keepdims=True), approx=True)

        ctx = jnp.dot(p, vh, preferred_element_type=jnp.float32)     # (L, E)
        acc = acc + jnp.dot(ctx, wo[lo:lo + d_keys, :],
                            preferred_element_type=jnp.float32)      # (L, d_llm)

    o_ref[0] = (acc + bo_ref[...]).astype(o_ref.dtype)


def fused_attention(target, k, v, wq_t, bq, wo_t, bo, n_heads, d_keys):
    B, L, d_model = target.shape
    S, dk = k.shape
    d_llm = wo_t.shape[1]
    kernel = functools.partial(_fused_attn_kernel,
                               n_heads=n_heads, d_keys=d_keys)
    return pl.pallas_call(
        kernel,
        out_shape=jax.ShapeDtypeStruct((B, L, d_llm), target.dtype),
        grid_spec=pltpu.PrefetchScalarGridSpec(
            num_scalar_prefetch=0,
            grid=(B,),
            in_specs=[
                pl.BlockSpec((1, L, d_model), lambda b: (b, 0, 0)),   # target[b]
                pl.BlockSpec((S, dk), lambda b: (0, 0)),              # k (constant)
                pl.BlockSpec((S, dk), lambda b: (0, 0)),              # v (constant)
                pl.BlockSpec((d_model, dk), lambda b: (0, 0)),        # WqT (constant)
                pl.BlockSpec((1, dk), lambda b: (0, 0)),              # bq
                pl.BlockSpec((dk, d_llm), lambda b: (0, 0)),          # WoT (constant)
                pl.BlockSpec((1, d_llm), lambda b: (0, 0)),           # bo
            ],
            out_specs=pl.BlockSpec((1, L, d_llm), lambda b: (b, 0, 0)),
        ),
        compiler_params=pltpu.CompilerParams(
            dimension_semantics=("parallel",)),    # B axis sharded on v7x 2-TC
    )(target, k, v, wq_t, bq, wo_t, bo)


# ----------------------------------------------------------------------------
# Full module forward
# ----------------------------------------------------------------------------
def reprogramming_layer_forward(params, target_embedding, source_embedding,
                                value_embedding, n_heads):
    B, L, d_model = target_embedding.shape
    S, d_llm = source_embedding.shape
    dk = params["wq"].shape[0]          # H * E
    E = dk // n_heads
    scale = 1.0 / sqrt(E)

    # Pre-transpose weights once (d_in, d_out); fold the softmax scale into
    # the query projection so the kernel never multiplies by `scale`.
    wq_t = (params["wq"] * scale).T                     # (d_model, dk)
    bq = (params["bq"] * scale).reshape(1, dk)
    wk_t = params["wk"].T                               # (d_llm, dk)
    bk = params["bk"].reshape(1, dk)
    wv_t = params["wv"].T                               # (d_llm, dk)
    bv = params["bv"].reshape(1, dk)
    wo_t = params["wo"].T                               # (dk, d_llm)
    bo = params["bo"].reshape(1, d_llm)

    # 1) K/V projection (once — independent of batch).
    k, v = kv_projection(source_embedding, value_embedding, wk_t, bk, wv_t, bv)

    # 2) Fused q-projection + attention + output projection.
    return fused_attention(target_embedding, k, v, wq_t, bq, wo_t, bo,
                           n_heads, E)                   # (B, L, d_llm)


# ----------------------------------------------------------------------------
# Pure-JAX reference for sanity check.
# ----------------------------------------------------------------------------
def reference_forward(params, target_embedding, source_embedding,
                      value_embedding, n_heads):
    B, L, _ = target_embedding.shape
    S, _ = source_embedding.shape
    H = n_heads
    q = target_embedding @ params["wq"].T + params["bq"]
    k = source_embedding @ params["wk"].T + params["bk"]
    v = value_embedding @ params["wv"].T + params["bv"]
    E = q.shape[-1] // H
    q = q.reshape(B, L, H, E)
    k = k.reshape(S, H, E)
    v = v.reshape(S, H, E)
    scale = 1.0 / sqrt(E)
    scores = jnp.einsum("blhe,she->bhls", q, k)
    A = jax.nn.softmax(scale * scores, axis=-1)
    out = jnp.einsum("bhls,she->blhe", A, v).reshape(B, L, H * E)
    return out @ params["wo"].T + params["bo"]


# ----------------------------------------------------------------------------
# Deterministic parameter init + demo
# ----------------------------------------------------------------------------
def init_params(key, d_model, n_heads, d_llm, d_keys=None):
    d_keys = d_keys or d_model // n_heads
    dk = d_keys * n_heads
    ks = jax.random.split(key, 8)
    return {
        "wq": 0.05 * jax.random.normal(ks[0], (dk, d_model), jnp.float32),
        "bq": 0.05 * jax.random.normal(ks[1], (dk,), jnp.float32),
        "wk": 0.05 * jax.random.normal(ks[2], (dk, d_llm), jnp.float32),
        "bk": 0.05 * jax.random.normal(ks[3], (dk,), jnp.float32),
        "wv": 0.05 * jax.random.normal(ks[4], (dk, d_llm), jnp.float32),
        "bv": 0.05 * jax.random.normal(ks[5], (dk,), jnp.float32),
        "wo": 0.05 * jax.random.normal(ks[6], (d_llm, dk), jnp.float32),
        "bo": 0.05 * jax.random.normal(ks[7], (d_llm,), jnp.float32),
    }


if __name__ == "__main__":
    # Small shapes consistent with the module's forward.
    B, L, S = 2, 8, 16
    d_model, n_heads, d_llm = 32, 4, 64   # d_keys = d_model // n_heads = 8

    key = jax.random.PRNGKey(0)
    kp, k1, k2, k3 = jax.random.split(key, 4)
    params = init_params(kp, d_model, n_heads, d_llm)

    target_embedding = jax.random.normal(k1, (B, L, d_model), jnp.float32)
    source_embedding = jax.random.normal(k2, (S, d_llm), jnp.float32)
    value_embedding = jax.random.normal(k3, (S, d_llm), jnp.float32)

    out = reprogramming_layer_forward(params, target_embedding,
                                      source_embedding, value_embedding,
                                      n_heads)
    out = jax.block_until_ready(out)

    ref = reference_forward(params, target_embedding, source_embedding,
                            value_embedding, n_heads)
    assert out.shape == (B, L, d_llm)
    # Slightly relaxed tolerance: softmax denominator uses the EUP approx
    # reciprocal (pl.reciprocal(approx=True)).
    assert jnp.allclose(out, ref, atol=1e-3, rtol=1e-3)

    print("KERNEL_OK")
</pallas_src>

<mosaic_0001>
module attributes {stable_mosaic.version = 11 : i64} {
  func.func @_kv_proj_kernel(%arg0: memref<16x64xf32, #tpu.memory_space<vmem>>, %arg1: memref<16x64xf32, #tpu.memory_space<vmem>>, %arg2: memref<64x32xf32, #tpu.memory_space<vmem>>, %arg3: memref<1x32xf32, #tpu.memory_space<vmem>>, %arg4: memref<64x32xf32, #tpu.memory_space<vmem>>, %arg5: memref<1x32xf32, #tpu.memory_space<vmem>>, %arg6: memref<16x32xf32, #tpu.memory_space<vmem>>, %arg7: memref<16x32xf32, #tpu.memory_space<vmem>>) attributes {dimension_semantics = [], scalar_prefetch = 0 : i64, scratch_operands = 0 : i64, tpu.core_type = #tpu.core_type<tc>} {
    %c0 = arith.constant 0 : index
    %c0_0 = arith.constant 0 : index
    %0 = vector.load %arg0[%c0, %c0_0] : memref<16x64xf32, #tpu.memory_space<vmem>>, vector<16x64xf32>
    %c0_1 = arith.constant 0 : index
    %c0_2 = arith.constant 0 : index
    %1 = vector.load %arg2[%c0_1, %c0_2] : memref<64x32xf32, #tpu.memory_space<vmem>>, vector<64x32xf32>
    %cst = arith.constant dense<0.000000e+00> : vector<16x32xf32>
    %2 = tpu.matmul %0, %1, %cst {dimension_numbers = #tpu.dot_dimension_numbers<[1], [0], [0], [1], [0, 0, 1, 1], [], []>} : vector<16x64xf32>, vector<64x32xf32>, vector<16x32xf32> -> vector<16x32xf32>
    %c0_3 = arith.constant 0 : index
    %c0_4 = arith.constant 0 : index
    %3 = vector.load %arg3[%c0_3, %c0_4] : memref<1x32xf32, #tpu.memory_space<vmem>>, vector<1x32xf32>
    %4 = vector.broadcast %3 : vector<1x32xf32> to vector<16x32xf32>
    %5 = arith.addf %2, %4 : vector<16x32xf32>
    %c0_5 = arith.constant 0 : index
    %c0_6 = arith.constant 0 : index
    %6 = vector.load %arg1[%c0_5, %c0_6] : memref<16x64xf32, #tpu.memory_space<vmem>>, vector<16x64xf32>
    %c0_7 = arith.constant 0 : index
    %c0_8 = arith.constant 0 : index
    %7 = vector.load %arg4[%c0_7, %c0_8] : memref<64x32xf32, #tpu.memory_space<vmem>>, vector<64x32xf32>
    %cst_9 = arith.constant dense<0.000000e+00> : vector<16x32xf32>
    %8 = tpu.matmul %6, %7, %cst_9 {dimension_numbers = #tpu.dot_dimension_numbers<[1], [0], [0], [1], [0, 0, 1, 1], [], []>} : vector<16x64xf32>, vector<64x32xf32>, vector<16x32xf32> -> vector<16x32xf32>
    %c0_10 = arith.constant 0 : index
    %c0_11 = arith.constant 0 : index
    %9 = vector.load %arg5[%c0_10, %c0_11] : memref<1x32xf32, #tpu.memory_space<vmem>>, vector<1x32xf32>
    %10 = vector.broadcast %9 : vector<1x32xf32> to vector<16x32xf32>
    %11 = arith.addf %8, %10 : vector<16x32xf32>
    %c0_12 = arith.constant 0 : index
    %c0_13 = arith.constant 0 : index
    %12 = vector.load %arg6[%c0_12, %c0_13] : memref<16x32xf32, #tpu.memory_space<vmem>>, vector<16x32xf32>
    tpu.vector_store %arg6[%c0_12, %c0_13], %5 {strides = array<i32>} : memref<16x32xf32, #tpu.memory_space<vmem>>, vector<16x32xf32>,
    %c0_14 = arith.constant 0 : index
    %c0_15 = arith.constant 0 : index
    %13 = vector.load %arg7[%c0_14, %c0_15] : memref<16x32xf32, #tpu.memory_space<vmem>>, vector<16x32xf32>
    tpu.vector_store %arg7[%c0_14, %c0_15], %11 {strides = array<i32>} : memref<16x32xf32, #tpu.memory_space<vmem>>, vector<16x32xf32>,
    return
  }
}

</mosaic_0001>

<bundles_post_ra>
// kernel: tpu_custom_call.1
= control target key start
LH: loop header
LB: loop body
LE: loop exit
PB: predicated region body
PF: predicated region fallthrough
CT: control target
= control target key end

     0   :  { %13 = vsyncpa [#allocation3], 0  ;;  %vm44_vm0 = vcmask 523264   ;;  %s554_s0 = inlined_call_operand.vmem [shape: f32[16,64], index: 0, kind: input, shape index: {}]   ;;  %s555_s1 = inlined_call_operand.vmem [shape: f32[16,64], index: 1, kind: input, shape index: {}]   ;;  %s556_s2 = inlined_call_operand.vmem [shape: f32[64,32], index: 2, kind: input, shape index: {}]   ;;  %s557_s3 = inlined_call_operand.vmem [shape: f32[1,32], index: 3, kind: input, shape index: {}]   ;;  %s558_s4 = inlined_call_operand.vmem [shape: f32[64,32], index: 4, kind: input, shape index: {}]   ;;  %s559_s5 = inlined_call_operand.vmem [shape: f32[1,32], index: 5, kind: input, shape index: {}]   ;;  %s560_s6 = inlined_call_operand.hbm [shape: f32[16,32], index: 6, kind: output, shape index: {0}]   ;;  %s561_s7 = inlined_call_operand.hbm [shape: f32[16,32], index: 7, kind: output, shape index: {1}]  }
   0x1   :  { %v29_v0 = vld [vmem:[%s556_s2] sm:$0xff]  ;;  %v30_v1 = vld [vmem:[%s556_s2 + $0x8] sm:$0xff]  ;;  %v31_v5 = vld [vmem:[%s556_s2 + $0x10] sm:$0xff] }
   0x2   :  { %v128_v2 = vld [vmem:[%s558_s4] sm:$0xff]  ;;  %v325_v3 = vpack.c.bf16 %v30_v1, %v29_v0  ;;  %v129_v4 = vld [vmem:[%s558_s4 + $0x8] sm:$0xff]  ;;  %v32_v6 = vld [vmem:[%s556_s2 + $0x18] sm:$0xff] }
   0x3   :  { %v341_v7 = vpack.c.bf16 %v129_v4, %v128_v2  ;;  %v329_v8 = vpack.c.bf16 %v32_v6, %v31_v5  ;;  %v130_v9 = vld [vmem:[%s558_s4 + $0x10] sm:$0xff]  ;;  %v131_v10 = vld [vmem:[%s558_s4 + $0x18] sm:$0xff]  ;;  %v33_v11 = vld [vmem:[%s556_s2 + $0x20] sm:$0xff] }
   0x4   :  { %326 = vmatprep.subr.bf16.mxu0 %v325_v3  ;;  %v345_v12 = vpack.c.bf16 %v131_v10, %v130_v9  ;;  %v34_v13 = vld [vmem:[%s556_s2 + $0x28] sm:$0xff]  ;;  %v132_v14 = vld [vmem:[%s558_s4 + $0x20] sm:$0xff]  ;;  %v35_v20 = vld [vmem:[%s556_s2 + $0x30] sm:$0xff] }
   0x5   :  { %v133_v15 = vld [vmem:[%s558_s4 + $0x28] sm:$0xff]  ;;  %342 = vmatprep.subr.bf16.mxu1 %v341_v7  ;;  %328 = vmatpush3.bf16.msra.mxu0 %v325_v3  ;;  %v333_v16 = vpack.c.bf16 %v34_v13, %v33_v11  ;;  %v27_v17 = vld [vmem:[%s554_s0] sm:$0xff]  ;;  %v36_v21 = vld [vmem:[%s556_s2 + $0x38] sm:$0xff] }
   0x6   :  { %344 = vmatpush3.bf16.msra.mxu1 %v341_v7  ;;  %330 = vmatprep.subr.bf16.mxu0 %v329_v8  ;;  %v126_v18 = vld [vmem:[%s555_s1] sm:$0xff]  ;;  %v349_v19 = vpack.c.bf16 %v133_v15, %v132_v14 }
   0x7   :  { %346 = vmatprep.subr.bf16.mxu1 %v345_v12  ;;  %303 = vmatprep.mubr.msk.f32.mxu0 %vm44_vm0, %v27_v17 }
   0x8   :  { %14 = vsyncpa [#allocation5], 0  ;;  %v134_v22 = vld [vmem:[%s558_s4 + $0x30] sm:$0xff]  ;;  %v135_v23 = vld [vmem:[%s558_s4 + $0x38] sm:$0xff]  ;;  %322 = vmatprep.mubr.msk.f32.mxu1 %vm44_vm0, %v126_v18  ;;  %v337_v24 = vpack.c.bf16 %v36_v21, %v35_v20  ;;  %s409_s18 = smov [#allocation2]   ;;  %vm224_vm1 = vcmask 261120  }
   0x9   :  { %332 = vmatpush3.bf16.msra.mxu0 %v329_v8  ;;  %v353_v25 = vpack.c.bf16 %v135_v23, %v134_v22  ;;  %v28_v26 = vld [vmem:[%s554_s0 + $0x8] sm:$0xff]  ;;  %v261_v28 = vld [vmem:[%s557_s3] ss:$0 sm:$0xff]  ;;  %s234_s19 = sshll.u32 %s409_s18, 4  ;;  %s410_s0 = smov [#allocation4]   ;;  %s235_s19 = int_to_ptr.vmem [resolvable:$true] %s234_s19 }
   0xa   :  { %348 = vmatpush3.bf16.msra.mxu1 %v345_v12  ;;  %334 = vmatprep.subr.bf16.mxu0 %v333_v16  ;;  %v127_v27 = vld [vmem:[%s555_s1 + $0x8] sm:$0xff]  ;;  %v264_v29 = vld [vmem:[%s559_s5] ss:$0 sm:$0xff]  ;;  %s246_s22 = sshll.u32 %s410_s0, 4  ;;  %s361_s1 = scalar_lea.vmem %s235_s19, 256  ;;  %s523_s22 = int_to_ptr.vmem [resolvable:$true] %s246_s22 }
   0xb   :  { %350 = vmatprep.subr.bf16.mxu1 %v349_v19  ;;  %p362_p0 = scmp.ne.s32.totalorder %s235_s19, %s361_s1  ;;  %p366_p1 = scmp.lt.s32.totalorder %s235_s19, %s235_s19 }
   0xc   :  { %p367_p2 = scmp.lt.s32.totalorder %s361_s1, %s361_s1 }
   0xd   :  { %336 = vmatpush3.bf16.msra.mxu0 %v333_v16 }
   0xe   :  { %352 = vmatpush3.bf16.msra.mxu1 %v349_v19  ;;  %338 = vmatprep.subr.bf16.mxu0 %v337_v24  ;;  %p368_p3 = por %p367_p2, %p366_p1 }
   0xf   :  { %354 = vmatprep.subr.bf16.mxu1 %v353_v25 }
  0x10   :  { %p369_p4 = pnand %p368_p3, %p362_p0 }
  0x11   :  { %340 = vmatpush3.bf16.msra.mxu0 %v337_v24 }
  0x12   :  { %356 = vmatpush3.bf16.msra.mxu1 %v353_v25 }
  0x14   :  { %304 = vmatmul.mubr.msk.f32.vlgmr.msra.gmra.mrb[0].mxu0 %vm44_vm0, %v28_v26 }
  0x15   :  { %323 = vmatmul.mubr.msk.f32.vlgmr.msra.gmra.mrb[0].mxu1 %vm44_vm0, %v127_v27 }
  0xe7   :  { %v305_v30 = vpop.f32.mrb[0].mxu0 }
  0xe8   :  { %v123_v31 = vadd.f32 %v305_v30, %v261_v28  ;;  %v324_v32 = vpop.f32.mrb[0].mxu1  ;;  %v117_v33 = vpop.f32.mrb[1].mxu0 }
  0xe9   :  { %v221_v34 = vadd.f32 %v324_v32, %v264_v29  ;;  %v118_v35 = vadd.f32 %v261_v28, %v117_v33  ;;  %v215_v36 = vpop.f32.mrb[1].mxu1 }
  0xea   :  { %226 = vst.msk [vmem:[#allocation2 + $0x8] sm:$0xff] %vm224_vm1, %v123_v31  ;;  %v216_v37 = vadd.f32 %v264_v29, %v215_v36 }
  0xeb   :  { %228 = vst.msk [vmem:[#allocation4 + $0x8] sm:$0xff] %vm224_vm1, %v221_v34  ;;  %225 = vst.msk [vmem:[#allocation2] sm:$0xff] %vm224_vm1, %v118_v35 }
  0xec   :  { %227 = vst.msk [vmem:[#allocation4] sm:$0xff] %vm224_vm1, %v216_v37 }
  0xed   :  { %372 = shalt.err (!%p369_p4)
}
  0xee   :  { %s373_s23 = scalar_lea.hbm %s560_s6, 256 }
  0xef   :  { %p374_p5 = scmp.ne.s32.totalorder %s560_s6, %s373_s23  ;;  %p377_p6 = scmp.lt.u32.totalorder %s373_s23, %s560_s6 }
  0xf1   :  { %p379_p7 = pnand %p377_p6, %p374_p5 }
  0xf3   :  { %382 = shalt.err (!%p379_p7)
}
  0xf4   :  { %s411_s28 = smov 128   ;;  %s412_s29 = smov 8  }
  0xf5   :  { %240 = dma.vmem_to_hbm [thread:$0]  %s235_s19, 256, %s560_s6, [#allocation3], %s411_s28, %s411_s28, %s412_s29  }
  0xf6   :  { %s383_s9 = scalar_lea.vmem %s523_s22, 256  ;;  %p388_p9 = scmp.lt.s32.totalorder %s523_s22, %s523_s22 }
  0xf7   :  { %p384_p8 = scmp.ne.s32.totalorder %s523_s22, %s383_s9  ;;  %p389_p10 = scmp.lt.s32.totalorder %s383_s9, %s383_s9 }
  0xf9   :  { %p390_p11 = por %p389_p10, %p388_p9 }
  0xfb   :  { %p391_p12 = pnand %p390_p11, %p384_p8 }
  0xfd   :  { %394 = shalt.err (!%p391_p12)
}
  0xfe   :  { %s395_s12 = scalar_lea.hbm %s561_s7, 256 }
  0xff   :  { %p396_p13 = scmp.ne.s32.totalorder %s561_s7, %s395_s12  ;;  %p399_p0 = scmp.lt.u32.totalorder %s395_s12, %s561_s7 }
 0x101   :  { %p401_p1 = pnand %p399_p0, %p396_p13 }
 0x103   :  { %404 = shalt.err (!%p401_p1)
}
 0x104   :  { %252 = dma.vmem_to_hbm [thread:$0]  %s523_s22, 256, %s561_s7, [#allocation5], %s411_s28, %s411_s28, %s412_s29  }
 0x105   :  { %405 = dma.done.wait [#allocation3], 256  }
 0x106   :  { %406 = vsyncadd [#allocation3], 4294967040 }
 0x107   :  { %407 = dma.done.wait [#allocation5], 256  }
 0x108   :  { %408 = vsyncadd [#allocation5], 4294967040 }
 0x109   :  { %259 = vsyncpa [#allocation3], 1 }
 0x10a   :  { %260 = vsyncpa [#allocation5], 1 }

</bundles_post_ra>
